<compile_context>
chip_gen: v5e
topology: v5e:2x2
jax: 0.10.0
libtpu: 0.0.40
codegen_flags: <defaults>
</compile_context>

<pallas_src>
import functools

import jax
import jax.numpy as jnp
from jax.experimental import pallas as pl
from jax.experimental.pallas import tpu as pltpu


def _focal_kernel(*refs, gamma, has_alpha, mask_tail, s_orig):
    if has_alpha:
        logits_ref, target_ref, alpha_ref, out_ref = refs
    else:
        logits_ref, target_ref, out_ref = refs

    s = pl.program_id(1)

    @pl.when(s == 0)
    def _():
        out_ref[...] = jnp.zeros_like(out_ref)

    x = logits_ref[0]                     # (C, TS) f32
    t = target_ref[0]                     # (1, TS) i32
    C, TS = x.shape

    # Per-pixel log-softmax over the channel (sublane) axis, gathered at the target
    # class with a one-hot select.  No per-channel divide / full softmax tensor.
    x_max = jnp.max(x, axis=0, keepdims=True)                          # (1, TS)
    se = jnp.sum(jnp.exp(x - x_max), axis=0, keepdims=True)            # (1, TS)
    cls = jax.lax.broadcasted_iota(jnp.int32, (C, TS), 0)              # (C, TS)
    one_hot = cls == t                                                  # (C, TS)
    x_t = jnp.sum(jnp.where(one_hot, x, 0.0), axis=0, keepdims=True)   # (1, TS)
    logpt = x_t - x_max - jnp.log(se)                                   # (1, TS)
    pt = jnp.exp(logpt)                                                 # (1, TS)

    if has_alpha:
        # alpha gather via the same one-hot: at = alpha[target]
        at = jnp.sum(jnp.where(one_hot, alpha_ref[0], 0.0), axis=0, keepdims=True)
        logpt = logpt * at

    loss = -((1.0 - pt) ** gamma) * logpt                               # (1, TS)

    if mask_tail:
        # zero out spatial padding (only compiled in when padding was required)
        col = jax.lax.broadcasted_iota(jnp.int32, (1, TS), 1) + s * TS
        loss = jnp.where(col < s_orig, loss, 0.0)

    # Fold the tile down to 128 lanes with static 128-wide slices (no relayout),
    # and accumulate into the resident per-batch block.
    partial = loss[:, 0:128]
    for i in range(1, TS // 128):
        partial = partial + loss[:, i * 128:(i + 1) * 128]
    out_ref[...] += partial.reshape(1, 1, 128)


@functools.partial(
    jax.jit, static_argnames=("gamma", "size_average", "tile_s", "s_orig")
)
def _focal_loss_impl(logits_f, target_f, alpha_f, *, gamma, size_average, tile_s, s_orig):
    N, C, S_pad = logits_f.shape
    n_s = S_pad // tile_s
    has_alpha = alpha_f is not None
    mask_tail = s_orig != S_pad

    kernel = functools.partial(
        _focal_kernel,
        gamma=gamma,
        has_alpha=has_alpha,
        mask_tail=mask_tail,
        s_orig=s_orig,
    )

    in_specs = [
        pl.BlockSpec((1, C, tile_s), lambda n, s: (n, 0, s)),
        pl.BlockSpec((1, 1, tile_s), lambda n, s: (n, 0, s)),
    ]
    inputs = [logits_f, target_f]
    if has_alpha:
        in_specs.append(pl.BlockSpec((1, C, 1), lambda n, s: (0, 0, 0)))
        inputs.append(alpha_f)

    out = pl.pallas_call(
        kernel,
        out_shape=jax.ShapeDtypeStruct((N, 1, 128), jnp.float32),
        grid_spec=pltpu.PrefetchScalarGridSpec(
            num_scalar_prefetch=0,
            grid=(N, n_s),
            in_specs=in_specs,
            out_specs=pl.BlockSpec((1, 1, 128), lambda n, s: (n, 0, 0)),
        ),
        compiler_params=pltpu.CompilerParams(
            dimension_semantics=("parallel", "arbitrary"),
        ),
    )(*inputs)

    total = jnp.sum(out)
    if size_average:
        return total / jnp.float32(N * s_orig)
    return total


def focal_loss(logits, target, gamma=2, alpha=None, size_average=True, max_tile_s=2048):
    """logits: [N, C, *spatial] float; target: [N, 1, *spatial] (or [N, *spatial]) class ids."""
    N, C = int(logits.shape[0]), int(logits.shape[1])
    S = 1
    for d in logits.shape[2:]:
        S *= int(d)
    if S == 0:
        raise ValueError("empty spatial extent")

    logits_f = jnp.reshape(logits, (N, C, S)).astype(jnp.float32)
    target_f = jnp.reshape(target, (N, 1, S)).astype(jnp.int32)

    # alpha normalization mirroring the PyTorch module
    if alpha is None:
        alpha_f = None
    else:
        if isinstance(alpha, (float, int)):
            alpha_vec = jnp.asarray([alpha, 1.0 - alpha], jnp.float32)
        else:
            alpha_vec = jnp.asarray(alpha, jnp.float32).reshape(-1)
        if int(alpha_vec.shape[0]) != C:
            raise ValueError("alpha must provide one weight per class")
        alpha_f = alpha_vec.reshape(1, C, 1)

    # Spatial tiling: use the largest lane-multiple tile that fits a small VMEM budget
    # (double-buffered logits tile = 2 * C * tile_s * 4 B), pad S only if needed.
    lane = 128
    budget_bytes = 4 * 1024 * 1024
    cap = min(int(max_tile_s), budget_bytes // (4 * C))
    cap = max(lane, (cap // lane) * lane)
    s_128 = ((S + lane - 1) // lane) * lane
    if s_128 <= cap:
        tile_s = s_128
        s_pad = s_128
    else:
        tile_s = cap
        s_pad = ((S + tile_s - 1) // tile_s) * tile_s

    if s_pad != S:
        pad = s_pad - S
        logits_f = jnp.pad(logits_f, ((0, 0), (0, 0), (0, pad)))
        target_f = jnp.pad(target_f, ((0, 0), (0, 0), (0, pad)))

    # keep integer gamma as an integer power (lowers to VPU multiplies, not pow)
    gamma_static = int(gamma) if float(gamma).is_integer() else float(gamma)

    return _focal_loss_impl(
        logits_f, target_f, alpha_f,
        gamma=gamma_static, size_average=bool(size_average),
        tile_s=int(tile_s), s_orig=int(S),
    )


def _reference(logits, target, gamma=2, alpha=None, size_average=True):
    """Pure-JAX reference mirroring the PyTorch FocalLoss.forward."""
    N, C = logits.shape[0], logits.shape[1]
    x = jnp.reshape(logits, (N, C, -1)).astype(jnp.float32)
    x = jnp.transpose(x, (0, 2, 1)).reshape(-1, C)          # (P, C)
    t = jnp.reshape(target, (-1,)).astype(jnp.int32)        # (P,)
    logp = jax.nn.log_softmax(x, axis=1)
    logpt = jnp.take_along_axis(logp, t[:, None], axis=1)[:, 0]
    pt = jnp.exp(logpt)
    if alpha is not None:
        if isinstance(alpha, (float, int)):
            a = jnp.asarray([alpha, 1.0 - alpha], jnp.float32)
        else:
            a = jnp.asarray(alpha, jnp.float32)
        logpt = logpt * a[t]
    loss = -((1.0 - pt) ** gamma) * logpt
    return loss.mean() if size_average else loss.sum()


if __name__ == "__main__":
    key = jax.random.PRNGKey(0)
    k1, k2 = jax.random.split(key, 2)

    N, C, H, W = 2, 4, 16, 16
    logits = jax.random.normal(k1, (N, C, H, W), jnp.float32)
    target = jax.random.randint(k2, (N, 1, H, W), 0, C, jnp.int32)

    # default FocalLoss(gamma=2, alpha=None, size_average=True)
    loss = focal_loss(logits, target)
    jax.block_until_ready(loss)
    ref = _reference(logits, target)
    assert jnp.allclose(loss, ref, atol=1e-5, rtol=1e-5), (loss, ref)

    # per-class alpha weights + sum reduction
    alpha = [0.1, 0.2, 0.3, 0.4]
    loss_a = focal_loss(logits, target, gamma=2, alpha=alpha, size_average=False)
    jax.block_until_ready(loss_a)
    ref_a = _reference(logits, target, gamma=2, alpha=alpha, size_average=False)
    assert jnp.allclose(loss_a, ref_a, atol=1e-4, rtol=1e-5), (loss_a, ref_a)

    print("KERNEL_OK")
</pallas_src>

<mosaic_0001>
module attributes {stable_mosaic.version = 11 : i64} {
  func.func @_focal_kernel(%arg0: i32, %arg1: i32, %arg2: memref<1x4x256xf32, #tpu.memory_space<vmem>>, %arg3: memref<1x1x256xi32, #tpu.memory_space<vmem>>, %arg4: memref<1x1x128xf32, #tpu.memory_space<vmem>>) attributes {dimension_semantics = [#tpu.dimension_semantics<parallel>, #tpu.dimension_semantics<arbitrary>], iteration_bounds = array<i64: 2, 1>, scalar_prefetch = 0 : i64, scratch_operands = 0 : i64, tpu.core_type = #tpu.core_type<tc>, window_params = [{transform_indices = @transform_0, window_bounds = array<i64: 1, 4, 256>}, {transform_indices = @transform_1, window_bounds = array<i64: 1, 1, 256>}, {transform_indices = @transform_2, window_bounds = array<i64: 1, 1, 128>}]} {
    %c0_i32 = arith.constant 0 : i32
    %0 = arith.cmpi eq, %arg1, %c0_i32 : i32
    %1 = arith.extui %0 : i1 to i32
    %c0_i32_0 = arith.constant 0 : i32
    %2 = arith.cmpi ne, %1, %c0_i32_0 : i32
    scf.if %2 {
      %cst_17 = arith.constant 0.000000e+00 : f32
      %38 = vector.broadcast %cst_17 : f32 to vector<1x1x128xf32>
      %c0_18 = arith.constant 0 : index
      %c0_19 = arith.constant 0 : index
      %c0_20 = arith.constant 0 : index
      %39 = vector.load %arg4[%c0_18, %c0_19, %c0_20] : memref<1x1x128xf32, #tpu.memory_space<vmem>>, vector<1x1x128xf32>
      tpu.vector_store %arg4[%c0_18, %c0_19, %c0_20], %38 {strides = array<i32>} : memref<1x1x128xf32, #tpu.memory_space<vmem>>, vector<1x1x128xf32>,
    } else {
    }
    %c0 = arith.constant 0 : index
    %c0_1 = arith.constant 0 : index
    %c0_2 = arith.constant 0 : index
    %3 = vector.load %arg2[%c0, %c0_1, %c0_2] : memref<1x4x256xf32, #tpu.memory_space<vmem>>, vector<1x4x256xf32>
    %4 = vector.shape_cast %3 : vector<1x4x256xf32> to vector<4x256xf32>
    %c0_3 = arith.constant 0 : index
    %c0_4 = arith.constant 0 : index
    %c0_5 = arith.constant 0 : index
    %5 = vector.load %arg3[%c0_3, %c0_4, %c0_5] : memref<1x1x256xi32, #tpu.memory_space<vmem>>, vector<1x1x256xi32>
    %6 = vector.shape_cast %5 : vector<1x1x256xi32> to vector<1x256xi32>
    %cst = arith.constant dense<0xFF800000> : vector<256xf32>
    %7 = vector.multi_reduction <maximumf>, %4, %cst [0] : vector<4x256xf32> to vector<256xf32>
    %8 = vector.shape_cast %7 : vector<256xf32> to vector<1x256xf32>
    %9 = vector.broadcast %8 : vector<1x256xf32> to vector<4x256xf32>
    %10 = arith.subf %4, %9 : vector<4x256xf32>
    %11 = math.exp %10 : vector<4x256xf32>
    %cst_6 = arith.constant dense<0.000000e+00> : vector<256xf32>
    %12 = vector.multi_reduction <add>, %11, %cst_6 [0] : vector<4x256xf32> to vector<256xf32>
    %13 = vector.shape_cast %12 : vector<256xf32> to vector<1x256xf32>
    %14 = tpu.iota {dimensions = array<i32: 0>} : vector<4x256xi32>
    %15 = vector.broadcast %6 : vector<1x256xi32> to vector<4x256xi32>
    %16 = arith.cmpi eq, %14, %15 : vector<4x256xi32>
    %cst_7 = arith.constant 0.000000e+00 : f32
    %17 = vector.broadcast %cst_7 : f32 to vector<4x256xf32>
    %18 = arith.select %16, %4, %17 : vector<4x256xi1>, vector<4x256xf32>
    %cst_8 = arith.constant dense<0.000000e+00> : vector<256xf32>
    %19 = vector.multi_reduction <add>, %18, %cst_8 [0] : vector<4x256xf32> to vector<256xf32>
    %20 = vector.shape_cast %19 : vector<256xf32> to vector<1x256xf32>
    %21 = arith.subf %20, %8 : vector<1x256xf32>
    %22 = math.log %13 : vector<1x256xf32>
    %23 = arith.subf %21, %22 : vector<1x256xf32>
    %24 = math.exp %23 : vector<1x256xf32>
    %cst_9 = arith.constant 1.000000e+00 : f32
    %25 = vector.broadcast %cst_9 : f32 to vector<1x256xf32>
    %26 = arith.subf %25, %24 : vector<1x256xf32>
    %27 = arith.mulf %26, %26 : vector<1x256xf32>
    %cst_10 = arith.constant 0.000000e+00 : f32
    %28 = vector.broadcast %cst_10 : f32 to vector<1x256xf32>
    %29 = arith.subf %28, %27 : vector<1x256xf32>
    %30 = arith.mulf %29, %23 : vector<1x256xf32>
    %31 = vector.extract_strided_slice %30 {offsets = [0, 0], sizes = [1, 128], strides = [1, 1]} : vector<1x256xf32> to vector<1x128xf32>
    %32 = vector.extract_strided_slice %30 {offsets = [0, 128], sizes = [1, 128], strides = [1, 1]} : vector<1x256xf32> to vector<1x128xf32>
    %33 = arith.addf %31, %32 : vector<1x128xf32>
    %c0_11 = arith.constant 0 : index
    %c0_12 = arith.constant 0 : index
    %c0_13 = arith.constant 0 : index
    %34 = vector.load %arg4[%c0_11, %c0_12, %c0_13] : memref<1x1x128xf32, #tpu.memory_space<vmem>>, vector<1x1x128xf32>
    %35 = vector.shape_cast %33 : vector<1x128xf32> to vector<1x1x128xf32>
    %36 = arith.addf %34, %35 : vector<1x1x128xf32>
    %c0_14 = arith.constant 0 : index
    %c0_15 = arith.constant 0 : index
    %c0_16 = arith.constant 0 : index
    %37 = vector.load %arg4[%c0_14, %c0_15, %c0_16] : memref<1x1x128xf32, #tpu.memory_space<vmem>>, vector<1x1x128xf32>
    tpu.vector_store %arg4[%c0_14, %c0_15, %c0_16], %36 {strides = array<i32>} : memref<1x1x128xf32, #tpu.memory_space<vmem>>, vector<1x1x128xf32>,
    return
  }
  func.func @transform_0(%arg0: i32, %arg1: i32) -> (i32, i32, i32) {
    %c0_i32 = arith.constant 0 : i32
    %c0_i32_0 = arith.constant 0 : i32
    return %arg0, %c0_i32, %arg1 : i32, i32, i32
  }
  func.func @transform_1(%arg0: i32, %arg1: i32) -> (i32, i32, i32) {
    %c0_i32 = arith.constant 0 : i32
    %c0_i32_0 = arith.constant 0 : i32
    return %arg0, %c0_i32, %arg1 : i32, i32, i32
  }
  func.func @transform_2(%arg0: i32, %arg1: i32) -> (i32, i32, i32) {
    %c0_i32 = arith.constant 0 : i32
    %c0_i32_0 = arith.constant 0 : i32
    %c0_i32_1 = arith.constant 0 : i32
    return %arg0, %c0_i32, %c0_i32_0 : i32, i32, i32
  }
}

</mosaic_0001>

<bundles_post_ra>
// kernel: _focal_loss_impl.1
= control target key start
LH: loop header
LB: loop body
LE: loop exit
PB: predicated region body
PF: predicated region fallthrough
CT: control target
= control target key end

     0   :  { %7 = vsyncpa [#allocation3], 0  ;;  %s764_s0 = inlined_call_operand.hbm [shape: f32[2,4,256], index: 0, kind: input, shape index: {}]   ;;  %s765_s1 = inlined_call_operand.hbm [shape: s32[2,1,256], index: 1, kind: input, shape index: {}]   ;;  %s766_s2 = inlined_call_operand.vmem [shape: f32[2,1,128], index: 2, kind: output, shape index: {}]  }
   0x1   :  { %9 = vsyncpa [#allocation3 + $0x1], 0 }
   0x2   :  { %10 = vsyncpa [#allocation5], 0 }
   0x3   :  { %12 = vsyncpa [#allocation5 + $0x1], 0  ;;  %s641_s9 = smov 0   ;;  %s643_s10 = smov 0  }
   0x4   :  { %s645_s11 = smov 0   ;;  %s647_s12 = smov 0  }
   0x5   :  { %s649_s13 = smov 0   ;;  %s651_s14 = smov 0  }
   0x6 LB: > { %s423_s15 = sadd.s32 4294967295, %s623_s14   ;;  %s30_s16 = sadd.s32 1, %s619_s13  ;;  %s623_s14 = sphi %s651_s14, %s18_s14   ;;  %s619_s13 = sphi %s649_s13, %s774_s13   ;;  %s615_s12 = sphi %s647_s12, %s773_s12   ;;  %s611_s11 = sphi %s645_s11, %s772_s11   ;;  %s607_s10 = sphi %s643_s10, %s771_s10   ;;  %s603_s9 = sphi %s641_s9, %s770_s9  }
   0x7   : > { %p32_p0 = scmp.ge.s32.totalorder %s30_s16, 2  ;;  %s39_s17 = sadd.s32 1, %s611_s11 }
   0x8   : > { %p46_p1 = scmp.ne.s32.totalorder %s611_s11, %s607_s10  ;;  %p47_p2 = scmp.eq.s32.totalorder %s623_s14, 0 }
   0x9   : > { %s776_s16 = smov (%p32_p0, %s30_s16), 0  ;;  %p52_p4 = scmp.ne.s32.totalorder %s607_s10, %s603_s9 }
   0xa   : > { %p677_p3 = por %p47_p2, %p46_p1  ;;  %s34_s19 = ssub.s32 %s619_s13, %s776_s16 }
   0xb   : > { %p53_p5 = scmp.eq.s32.totalorder %s423_s15, 0  ;;  %p37_p6 = scmp.eq.s32.totalorder %s34_s19, 0 }
   0xc   : > { %p449_p8 = scmp.lt.s32.totalorder %s623_s14, 2  ;;  %s130_s22 = sand.u32 1, %s611_s11  }
   0xd   : > { %p684_p7 = por %p53_p5, %p52_p4  ;;  %s437_s23 = sshll.u32 %s619_s13, 3 }
   0xe   : > { %s690_s21 = scalar_select %p37_p6, %s611_s11, %s39_s17  }
   0xf   : > { %s427_s24 = sshll.u32 %s130_s22, 3  ;;  %s141_s27 = scalar_lea.hbm %s764_s0, %s437_s23 }
  0x10   : > { %s143_s28 = sshll.u32 %s141_s27, 4  ;;  %s134_s29 = scalar_lea.vmem [#allocation2], %s427_s24  ;;  %s144_s28 = int_to_ptr.hbm [resolvable:$true] %s143_s28 }
  0x11   : > { %s145_s30 = sshll.u32 %s134_s29, 4  ;;  %p699_p9 = pnand %p449_p8, %p677_p3  ;;  %s146_s30 = int_to_ptr.vmem [resolvable:$true] %s145_s30 }
  0x12   : > { %p432_p10 = scmp.ge.s32.totalorder %s623_s14, 1  ;;  %p171_p11 = scmp.lt.s32.totalorder %s623_s14, 3 }
  0x13   : > { %s430_s4 = sshll.u32 %s130_s22, 1  ;;  %s131_s5 = scalar_lea.sflag [#allocation3], %s130_s22 }
  0x14   : > { %445 = dma.hbm_to_vmem [thread:$0]  (!%p699_p9), %s144_s28, 128, %s146_s30, %s131_s5  }
  0x15   : > { %p172_p12 = pnand %p432_p10, %p171_p11  ;;  %s431_s6 = sshll.u32 %s619_s13, 1 }
  0x16   : > { %s156_s7 = scalar_lea.vmem [#allocation4], %s430_s4  ;;  %s162_s17 = scalar_lea.hbm %s765_s1, %s431_s6 }
  0x17   : > { %s166_s8 = sshll.u32 %s156_s7, 4  ;;  %s164_s18 = sshll.u32 %s162_s17, 4  ;;  %s167_s8 = int_to_ptr.vmem [resolvable:$true] %s166_s8  ;;  %s165_s18 = int_to_ptr.hbm [resolvable:$true] %s164_s18 }
  0x18   : > { %s153_s19 = scalar_lea.sflag [#allocation5], %s130_s22  ;;  %175 = sbr.rel (%p172_p12) target bundleno = 126 (0x7e), region = 28 }
  0x19   : > { %448 = dma.hbm_to_vmem [thread:$0]  (!%p699_p9), %s165_s18, 32, %s167_s8, %s153_s19  }
  0x1a   : > { %s177_s23 = sand.u32 (!%p172_p12), 1, %s607_s10  }
  0x1b   : > { %s433_s24 = sshll.u32 (!%p172_p12), %s177_s23, 3  ;;  %s178_s25 = scalar_lea.sflag (!%p172_p12), [#allocation3], %s177_s23 }
  0x1c   : > { %s181_s26 = scalar_lea.vmem (!%p172_p12), [#allocation2], %s433_s24 }
  0x1d   : > { %594 = dma.done.wait (%p684_p7), %s178_s25, 128  }
  0x1e   : > { %596 = vsyncadd (%p684_p7), %s178_s25, 4294967168  ;;  %s434_s27 = sshll.u32 %s177_s23, 1  ;;  %s188_s28 = scalar_lea.sflag [#allocation5], %s177_s23 }
  0x1f   : > { %s718_s29 = scalar_lea.vmem [#allocation4], %s434_s27 }
  0x20   : > { %598 = dma.done.wait (%p684_p7), %s188_s28, 32  }
  0x21   : > { %600 = vsyncadd (%p684_p7), %s188_s28, 4294967264  ;;  %v226_v0 = vld [vmem:[%s181_s26] sm:$0xff]  ;;  %vm234_vm0 = vcmask 1043456   ;;  %p218_p13 = scmp.lt.s32.totalorder %s615_s12, 1  ;;  %v625_v16 = vmov 0.0   ;;  %v277_v23 = vlaneseq }
  0x22   : > { %229 = vst [vmem:[#allocation1] ss:$2 sm:$0xff] %v226_v0  ;;  %v227_v24 = vld [vmem:[%s718_s29] sm:$0x3] }
  0x23   : > { %s778_s12 = smov (!%p218_p13, %s615_s12), 1  ;;  %v278_v29 = vshrl.u32 %v277_v23, 7  ;;  %v279_v32 = vperm.slane %v227_v24, 0  ;;  %v280_v33 = vperm.slane %v227_v24, 1 }
  0x24   : > { %s731_s30 = scalar_lea.vmem %s766_s2, %s778_s12 }
  0x25   : > { %225 = vst [vmem:[%s731_s30] sm:$0x1] %v625_v16  ;;  %vm281_vm1 = vcmp.eq.s32.totalorder %v278_v29, %v279_v32  ;;  %vm282_vm2 = vcmp.eq.s32.totalorder %v278_v29, %v280_v33 }
  0x29   : > { %v230_v1 = vld.sshfl [vmem:[#allocation1] sm:$0xff pattern:$0x75316420]  ;;  %v231_v2 = vld.sshfl [vmem:[#allocation1 + $0x8] sm:$0xff pattern:$0x75316420] }
  0x2a   : > { %v235_v3 = vsel %vm234_vm0, %v230_v1, -inf  ;;  %v242_v4 = vsel %vm234_vm0, %v231_v2, -inf }
  0x2b   : > { %v236_v5 = vrot.slane %v235_v3, 4  ;;  %v243_v6 = vrot.slane %v242_v4, 4 }
  0x2d   : > { %v237_v7 = vmax.f32 %v235_v3, %v236_v5  ;;  %v244_v8 = vmax.f32 %v242_v4, %v243_v6 }
  0x2f   : > { %v238_v9 = vrot.slane %v237_v7, 2  ;;  %v245_v10 = vrot.slane %v244_v8, 2 }
  0x31   : > { %v239_v11 = vmax.f32 %v237_v7, %v238_v9  ;;  %v246_v12 = vmax.f32 %v244_v8, %v245_v10 }
  0x33   : > { %v240_v13 = vrot.slane %v239_v11, 1  ;;  %v247_v14 = vrot.slane %v246_v12, 1 }
  0x35   : > { %v733_v15 = vmax.f32 %v246_v12, %v247_v14  ;;  %v241_v17 = vmax.f32 %v239_v11, %v240_v13 }
  0x37   : > { %v251_v18 = vrot.slane %v733_v15, 4 }
  0x39   : > { %v252_v19 = vsel %vm234_vm0, %v241_v17, %v251_v18  ;;  %v325_v18 = vld [vmem:[%s731_s30] sm:$0x1] }
  0x3a   : > { %v254_v20 = vsub.f32 %v226_v0, %v252_v19 }
  0x3c   : > { %v255_v21 = vmul.f32 1.442695, %v254_v20 }
  0x3e   : > { %499 = vpow2.f32 %v255_v21 }
  0x44   : > { %v500_v22 = vpop.eup %499 }
  0x45   : > { %258 = vst [vmem:[#allocation1] ss:$2 sm:$0xff] %v500_v22 }
  0x4c   : > { %v259_v25 = vld.sshfl [vmem:[#allocation1] sm:$0xff pattern:$0x75316420]  ;;  %v260_v26 = vld.sshfl [vmem:[#allocation1 + $0x8] sm:$0xff pattern:$0x75316420] }
  0x4d   : > { %v263_v27 = vsel %vm234_vm0, %v259_v25, 0.0  ;;  %v270_v28 = vsel %vm234_vm0, %v260_v26, 0.0  ;;  %283 = vst [vmem:[#allocation1] ss:$2 sm:$0xff] %v226_v0 }
  0x4e   : > { %v264_v30 = vrot.slane %v263_v27, 4  ;;  %v271_v31 = vrot.slane %v270_v28, 4 }
  0x50   : > { %v265_v34 = vadd.f32 %v264_v30, %v263_v27  ;;  %v272_v35 = vadd.f32 %v271_v31, %v270_v28 }
  0x52   : > { %v266_v36 = vrot.slane %v265_v34, 2  ;;  %v273_v37 = vrot.slane %v272_v35, 2 }
  0x54   : > { %v267_v38 = vadd.f32 %v266_v36, %v265_v34  ;;  %v274_v39 = vadd.f32 %v273_v37, %v272_v35  ;;  %v284_v40 = vld.sshfl [vmem:[#allocation1] sm:$0xff pattern:$0x75316420]  ;;  %v285_v41 = vld.sshfl [vmem:[#allocation1 + $0x8] sm:$0xff pattern:$0x75316420] }
  0x55   : > { %v288_v42 = vsel %vm281_vm1, %v284_v40, 0.0  ;;  %v289_v43 = vsel %vm282_vm2, %v285_v41, 0.0 }
  0x56   : > { %v268_v44 = vrot.slane %v267_v38, 1  ;;  %v275_v45 = vrot.slane %v274_v39, 1  ;;  %v290_v46 = vsel %vm234_vm0, %v288_v42, 0.0  ;;  %v297_v47 = vsel %vm234_vm0, %v289_v43, 0.0 }
  0x57   : > { %v291_v48 = vrot.slane %v290_v46, 4  ;;  %v298_v49 = vrot.slane %v297_v47, 4 }
  0x58   : > { %v269_v50 = vadd.f32 %v268_v44, %v267_v38  ;;  %v276_v51 = vadd.f32 %v275_v45, %v274_v39 }
  0x59   : > { %v292_v52 = vadd.f32 %v291_v48, %v290_v46  ;;  %v299_v53 = vadd.f32 %v298_v49, %v297_v47 }
  0x5a   : > { %501 = vlog2.f32 %v269_v50 }
  0x5b   : > { %v293_v54 = vrot.slane %v292_v52, 2  ;;  %v300_v55 = vrot.slane %v299_v53, 2  ;;  %503 = vlog2.f32 %v276_v51 }
  0x5d   : > { %v294_v56 = vadd.f32 %v293_v54, %v292_v52  ;;  %v301_v57 = vadd.f32 %v300_v55, %v299_v53 }
  0x5f   : > { %v295_v58 = vrot.slane %v294_v56, 1  ;;  %v302_v59 = vrot.slane %v301_v57, 1 }
  0x60   : > { %v502_v60 = vpop.eup %501 }
  0x61   : > { %v504_v61 = vpop.eup %503  ;;  %v296_v62 = vadd.f32 %v295_v58, %v294_v56  ;;  %v303_v63 = vadd.f32 %v302_v59, %v301_v57  ;;  %v307_v2 = vmul.f32 0.6931472, %v502_v60 }
  0x62   : > { %v309_v3 = vmul.f32 0.6931472, %v504_v61 }
  0x63   : > { %v304_v0 = vsub.f32 %v296_v62, %v241_v17  ;;  %v305_v1 = vsub.f32 %v303_v63, %v733_v15 }
  0x65   : > { %v310_v4 = vsub.f32 %v304_v0, %v307_v2  ;;  %v311_v5 = vsub.f32 %v305_v1, %v309_v3 }
  0x67   : > { %v312_v6 = vmul.f32 1.442695, %v310_v4  ;;  %v314_v7 = vmul.f32 1.442695, %v311_v5 }
  0x69   : > { %505 = vpow2.f32 %v312_v6 }
  0x6a   : > { %507 = vpow2.f32 %v314_v7 }
  0x6f   : > { %v506_v8 = vpop.eup %505 }
  0x70   : > { %v508_v9 = vpop.eup %507  ;;  %v316_v10 = vsub.f32 1.0, %v506_v8 }
  0x71   : > { %v317_v11 = vsub.f32 1.0, %v508_v9 }
  0x72   : > { %v318_v12 = vmul.f32 %v316_v10, %v316_v10 }
  0x73   : > { %v319_v13 = vmul.f32 %v317_v11, %v317_v11 }
  0x74   : > { %v320_v14 = vsub.f32 0.0, %v318_v12 }
  0x75   : > { %v321_v16 = vsub.f32 0.0, %v319_v13 }
  0x76   : > { %v322_v17 = vmul.f32 %v320_v14, %v310_v4 }
  0x77   : > { %v323_v15 = vmul.f32 %v321_v16, %v311_v5 }
  0x79   : > { %v324_v19 = vadd.f32 %v323_v15, %v322_v17 }
  0x7b   : > { %v326_v20 = vadd.f32 %v325_v18, %v324_v19 }
  0x7d   : > { %327 = vst [vmem:[%s731_s30] sm:$0x1] %v326_v20 }
  0x7e PF: > { %s18_s14 = sadd.s32 1, %s623_s14   ;;  %s770_s9 = smov %s607_s10 }
  0x7f   : > { %p15_p0 = scmp.ge.s32.totalorder %s18_s14, 4   ;;  %s771_s10 = smov %s611_s11 }
  0x80   : > { %s772_s11 = smov %s690_s21  ;;  %s773_s12 = smov %s619_s13 }
  0x81   : > { %s774_s13 = smov %s776_s16  ;;  %17 = sbr.rel (!%p15_p0) target bundleno = 6 (0x6), region = 85 }
  0x86   :  { %345 = vsyncpa [#allocation3], 1 }
  0x87   :  { %347 = vsyncpa [#allocation3 + $0x1], 1 }
  0x88   :  { %348 = vsyncpa [#allocation5], 1 }
  0x89   :  { %350 = vsyncpa [#allocation5 + $0x1], 1 }

</bundles_post_ra>
